<compile_context>
chip_gen: v7x
topology: tpu7x:2x2x1
jax: 0.10.0
libtpu: 0.0.40
codegen_flags: <defaults>
</compile_context>

<pallas_src>
import jax
import jax.numpy as jnp
from jax.experimental import pallas as pl
from jax.experimental.pallas import tpu as pltpu


def _round_up(x, m):
    return ((x + m - 1) // m) * m


def net_forward_kernel(x_ref, w1_ref, b1_ref, w2_ref, b2_ref, w3_ref, b3_ref,
                       o_ref):
    """One batch tile: three dense layers, ReLU on the first two. All operands
    are zero-padded to lane/sublane-friendly shapes, so no masked lanes."""
    x = x_ref[...]                                                  # [TB, IN]
    h1 = jnp.dot(x, w1_ref[...], preferred_element_type=jnp.float32)
    h1 = jnp.maximum(h1 + b1_ref[...], 0.0)                         # [TB, H1]
    h2 = jnp.dot(h1, w2_ref[...], preferred_element_type=jnp.float32)
    h2 = jnp.maximum(h2 + b2_ref[...], 0.0)                         # [TB, H2]
    q = jnp.dot(h2, w3_ref[...], preferred_element_type=jnp.float32)
    o_ref[...] = q + b3_ref[...]                                    # [TB, OUT] lane-dense


def net_forward(states, params, *, tile_batch=1024):
    """Batched forward pass.

    states: [B, input_state] float32 (same batch-major layout as nn.Linear).
    params: (w1, b1, w2, b2, w3, b3) with weights stored [in, out].
    Returns [B, num_actions] float32 Q-values.
    """
    w1, b1, w2, b2, w3, b3 = params
    batch, in_dim = states.shape
    hidden1 = w1.shape[1]
    hidden2 = w2.shape[1]
    num_actions = w3.shape[1]

    # Hardware-friendly padded feature dims (zero padding -> identical math).
    IN = _round_up(in_dim, 8)
    H1 = _round_up(hidden1, 128)
    H2 = _round_up(hidden2, 128)
    OUT = _round_up(num_actions, 128)

    # Batch tile: multiple of 8 sublanes, capped so a double-buffered
    # (TB, 128) f32 in/out tile stays tiny vs. the 64 MiB VMEM on v7x.
    tb = min(tile_batch, _round_up(batch, 8))
    tb = _round_up(tb, 8)
    b_pad = _round_up(batch, tb)

    f32 = jnp.float32
    x_p = jnp.zeros((b_pad, IN), f32).at[:batch, :in_dim].set(states.astype(f32))
    w1_p = jnp.zeros((IN, H1), f32).at[:in_dim, :hidden1].set(w1)
    b1_p = jnp.zeros((1, H1), f32).at[:, :hidden1].set(b1)
    w2_p = jnp.zeros((H1, H2), f32).at[:hidden1, :hidden2].set(w2)
    b2_p = jnp.zeros((1, H2), f32).at[:, :hidden2].set(b2)
    w3_p = jnp.zeros((H2, OUT), f32).at[:hidden2, :num_actions].set(w3)
    b3_p = jnp.zeros((1, OUT), f32).at[:, :num_actions].set(b3)

    grid = (b_pad // tb,)

    flops = 2 * b_pad * (IN * H1 + H1 * H2 + H2 * OUT)
    bytes_accessed = 4 * (b_pad * IN + IN * H1 + H1 + H1 * H2 + H2
                          + H2 * OUT + OUT + b_pad * OUT)

    const_map = lambda i: (0, 0)   # weights/biases: VMEM-resident across steps

    out_padded = pl.pallas_call(
        net_forward_kernel,
        out_shape=jax.ShapeDtypeStruct((b_pad, OUT), f32),
        grid=grid,
        in_specs=[
            pl.BlockSpec((tb, IN), lambda i: (i, 0)),   # states: pipelined over batch
            pl.BlockSpec((IN, H1), const_map),
            pl.BlockSpec((1, H1), const_map),
            pl.BlockSpec((H1, H2), const_map),
            pl.BlockSpec((1, H2), const_map),
            pl.BlockSpec((H2, OUT), const_map),
            pl.BlockSpec((1, OUT), const_map),
        ],
        out_specs=pl.BlockSpec((tb, OUT), lambda i: (i, 0)),
        compiler_params=pltpu.CompilerParams(
            dimension_semantics=("parallel",)),
        cost_estimate=pl.CostEstimate(
            flops=flops, transcendentals=0, bytes_accessed=bytes_accessed),
    )(x_p, w1_p, b1_p, w2_p, b2_p, w3_p, b3_p)

    # Slice off batch / lane padding in the wrapper (cheap XLA slice).
    return out_padded[:batch, :num_actions]


def init_params(key, num_actions=2, hidden_layer_size=50, input_state=4):
    """PyTorch nn.Linear-style init: U(-1/sqrt(fan_in), +1/sqrt(fan_in)).
    Weights stored as [in_features, out_features]."""
    def linear(key, fan_in, fan_out):
        kw, kb = jax.random.split(key)
        bound = 1.0 / jnp.sqrt(jnp.float32(fan_in))
        w = jax.random.uniform(kw, (fan_in, fan_out), jnp.float32, -bound, bound)
        b = jax.random.uniform(kb, (1, fan_out), jnp.float32, -bound, bound)
        return w, b

    k1, k2, k3 = jax.random.split(key, 3)
    w1, b1 = linear(k1, input_state, 32)
    w2, b2 = linear(k2, 32, hidden_layer_size)
    w3, b3 = linear(k3, hidden_layer_size, num_actions)
    return (w1, b1, w2, b2, w3, b3)


def reference_forward(states, params):
    """Pure-JAX reference for correctness checks."""
    w1, b1, w2, b2, w3, b3 = params
    h1 = jnp.maximum(states @ w1 + b1, 0.0)
    h2 = jnp.maximum(h1 @ w2 + b2, 0.0)
    return h2 @ w3 + b3


if __name__ == "__main__":
    key = jax.random.PRNGKey(0)
    k_params, k_states = jax.random.split(key)

    num_actions = 2
    hidden_layer_size = 50
    input_state = 4
    params = init_params(k_params, num_actions, hidden_layer_size, input_state)

    # Small DQN-style batch (acting path).
    batch = 8
    states = jax.random.normal(k_states, (batch, input_state), jnp.float32)
    q_values = net_forward(states, params)
    jax.block_until_ready(q_values)
    q_ref = reference_forward(states, params)
    assert q_values.shape == (batch, num_actions)
    assert jnp.allclose(q_values, q_ref, atol=1e-5, rtol=1e-5)

    # Larger batch exercising a multi-step (pipelined, parallel) batch grid.
    k_big = jax.random.fold_in(k_states, 1)
    big_batch = 64
    big_states = jax.random.normal(k_big, (big_batch, input_state), jnp.float32)
    q_big = net_forward(big_states, params, tile_batch=16)   # grid=(4,)
    jax.block_until_ready(q_big)
    q_big_ref = reference_forward(big_states, params)
    assert q_big.shape == (big_batch, num_actions)
    assert jnp.allclose(q_big, q_big_ref, atol=1e-5, rtol=1e-5)

    print("KERNEL_OK")
</pallas_src>

<mosaic_0001>
module attributes {stable_mosaic.version = 11 : i64} {
  func.func @net_forward_kernel(%arg0: i32, %arg1: memref<8x8xf32, #tpu.memory_space<vmem>>, %arg2: memref<8x128xf32, #tpu.memory_space<vmem>>, %arg3: memref<1x128xf32, #tpu.memory_space<vmem>>, %arg4: memref<128x128xf32, #tpu.memory_space<vmem>>, %arg5: memref<1x128xf32, #tpu.memory_space<vmem>>, %arg6: memref<128x128xf32, #tpu.memory_space<vmem>>, %arg7: memref<1x128xf32, #tpu.memory_space<vmem>>, %arg8: memref<8x128xf32, #tpu.memory_space<vmem>>) attributes {dimension_semantics = [#tpu.dimension_semantics<parallel>], iteration_bounds = array<i64: 1>, scalar_prefetch = 0 : i64, scratch_operands = 0 : i64, tpu.core_type = #tpu.core_type<tc>, window_params = [{transform_indices = @transform_0, window_bounds = array<i64: 8, 8>}, {pipeline_mode = #tpu.pipeline_mode<synchronous>, transform_indices = @transform_1, window_bounds = array<i64: 8, 128>}, {pipeline_mode = #tpu.pipeline_mode<synchronous>, transform_indices = @transform_2, window_bounds = array<i64: 1, 128>}, {pipeline_mode = #tpu.pipeline_mode<synchronous>, transform_indices = @transform_3, window_bounds = array<i64: 128, 128>}, {pipeline_mode = #tpu.pipeline_mode<synchronous>, transform_indices = @transform_4, window_bounds = array<i64: 1, 128>}, {pipeline_mode = #tpu.pipeline_mode<synchronous>, transform_indices = @transform_5, window_bounds = array<i64: 128, 128>}, {pipeline_mode = #tpu.pipeline_mode<synchronous>, transform_indices = @transform_6, window_bounds = array<i64: 1, 128>}, {transform_indices = @transform_7, window_bounds = array<i64: 8, 128>}]} {
    %c0 = arith.constant 0 : index
    %c0_0 = arith.constant 0 : index
    %0 = vector.load %arg1[%c0, %c0_0] : memref<8x8xf32, #tpu.memory_space<vmem>>, vector<8x8xf32>
    %c0_1 = arith.constant 0 : index
    %c0_2 = arith.constant 0 : index
    %1 = vector.load %arg2[%c0_1, %c0_2] : memref<8x128xf32, #tpu.memory_space<vmem>>, vector<8x128xf32>
    %cst = arith.constant dense<0.000000e+00> : vector<8x128xf32>
    %2 = tpu.matmul %0, %1, %cst {dimension_numbers = #tpu.dot_dimension_numbers<[1], [0], [0], [1], [0, 0, 1, 1], [], []>} : vector<8x8xf32>, vector<8x128xf32>, vector<8x128xf32> -> vector<8x128xf32>
    %c0_3 = arith.constant 0 : index
    %c0_4 = arith.constant 0 : index
    %3 = vector.load %arg3[%c0_3, %c0_4] : memref<1x128xf32, #tpu.memory_space<vmem>>, vector<1x128xf32>
    %4 = vector.broadcast %3 : vector<1x128xf32> to vector<8x128xf32>
    %5 = arith.addf %2, %4 : vector<8x128xf32>
    %cst_5 = arith.constant 0.000000e+00 : f32
    %6 = vector.broadcast %cst_5 : f32 to vector<8x128xf32>
    %7 = arith.maximumf %5, %6 : vector<8x128xf32>
    %c0_6 = arith.constant 0 : index
    %c0_7 = arith.constant 0 : index
    %8 = vector.load %arg4[%c0_6, %c0_7] : memref<128x128xf32, #tpu.memory_space<vmem>>, vector<128x128xf32>
    %cst_8 = arith.constant dense<0.000000e+00> : vector<8x128xf32>
    %9 = tpu.matmul %7, %8, %cst_8 {dimension_numbers = #tpu.dot_dimension_numbers<[1], [0], [0], [1], [0, 0, 1, 1], [], []>} : vector<8x128xf32>, vector<128x128xf32>, vector<8x128xf32> -> vector<8x128xf32>
    %c0_9 = arith.constant 0 : index
    %c0_10 = arith.constant 0 : index
    %10 = vector.load %arg5[%c0_9, %c0_10] : memref<1x128xf32, #tpu.memory_space<vmem>>, vector<1x128xf32>
    %11 = vector.broadcast %10 : vector<1x128xf32> to vector<8x128xf32>
    %12 = arith.addf %9, %11 : vector<8x128xf32>
    %cst_11 = arith.constant 0.000000e+00 : f32
    %13 = vector.broadcast %cst_11 : f32 to vector<8x128xf32>
    %14 = arith.maximumf %12, %13 : vector<8x128xf32>
    %c0_12 = arith.constant 0 : index
    %c0_13 = arith.constant 0 : index
    %15 = vector.load %arg6[%c0_12, %c0_13] : memref<128x128xf32, #tpu.memory_space<vmem>>, vector<128x128xf32>
    %cst_14 = arith.constant dense<0.000000e+00> : vector<8x128xf32>
    %16 = tpu.matmul %14, %15, %cst_14 {dimension_numbers = #tpu.dot_dimension_numbers<[1], [0], [0], [1], [0, 0, 1, 1], [], []>} : vector<8x128xf32>, vector<128x128xf32>, vector<8x128xf32> -> vector<8x128xf32>
    %c0_15 = arith.constant 0 : index
    %c0_16 = arith.constant 0 : index
    %17 = vector.load %arg7[%c0_15, %c0_16] : memref<1x128xf32, #tpu.memory_space<vmem>>, vector<1x128xf32>
    %18 = vector.broadcast %17 : vector<1x128xf32> to vector<8x128xf32>
    %19 = arith.addf %16, %18 : vector<8x128xf32>
    %c0_17 = arith.constant 0 : index
    %c0_18 = arith.constant 0 : index
    %20 = vector.load %arg8[%c0_17, %c0_18] : memref<8x128xf32, #tpu.memory_space<vmem>>, vector<8x128xf32>
    tpu.vector_store %arg8[%c0_17, %c0_18], %19 {strides = array<i32>} : memref<8x128xf32, #tpu.memory_space<vmem>>, vector<8x128xf32>,
    return
  }
  func.func @transform_0(%arg0: i32) -> (i32, i32) {
    %c0_i32 = arith.constant 0 : i32
    %c0_i32_0 = arith.constant 0 : i32
    return %arg0, %c0_i32 : i32, i32
  }
  func.func @transform_1(%arg0: i32) -> (i32, i32) {
    %c0_i32 = arith.constant 0 : i32
    %c0_i32_0 = arith.constant 0 : i32
    %c0_i32_1 = arith.constant 0 : i32
    return %c0_i32, %c0_i32_0 : i32, i32
  }
  func.func @transform_2(%arg0: i32) -> (i32, i32) {
    %c0_i32 = arith.constant 0 : i32
    %c0_i32_0 = arith.constant 0 : i32
    %c0_i32_1 = arith.constant 0 : i32
    return %c0_i32, %c0_i32_0 : i32, i32
  }
  func.func @transform_3(%arg0: i32) -> (i32, i32) {
    %c0_i32 = arith.constant 0 : i32
    %c0_i32_0 = arith.constant 0 : i32
    %c0_i32_1 = arith.constant 0 : i32
    return %c0_i32, %c0_i32_0 : i32, i32
  }
  func.func @transform_4(%arg0: i32) -> (i32, i32) {
    %c0_i32 = arith.constant 0 : i32
    %c0_i32_0 = arith.constant 0 : i32
    %c0_i32_1 = arith.constant 0 : i32
    return %c0_i32, %c0_i32_0 : i32, i32
  }
  func.func @transform_5(%arg0: i32) -> (i32, i32) {
    %c0_i32 = arith.constant 0 : i32
    %c0_i32_0 = arith.constant 0 : i32
    %c0_i32_1 = arith.constant 0 : i32
    return %c0_i32, %c0_i32_0 : i32, i32
  }
  func.func @transform_6(%arg0: i32) -> (i32, i32) {
    %c0_i32 = arith.constant 0 : i32
    %c0_i32_0 = arith.constant 0 : i32
    %c0_i32_1 = arith.constant 0 : i32
    return %c0_i32, %c0_i32_0 : i32, i32
  }
  func.func @transform_7(%arg0: i32) -> (i32, i32) {
    %c0_i32 = arith.constant 0 : i32
    %c0_i32_0 = arith.constant 0 : i32
    return %arg0, %c0_i32 : i32, i32
  }
}

</mosaic_0001>

<bundles_post_ra>
// kernel: tpu_custom_call.1
= control target key start
LH: loop header
LB: loop body
LE: loop exit
PB: predicated region body
PF: predicated region fallthrough
CT: control target
= control target key end

     0   :  { %12 = vsyncpa [#allocation3], 0  ;;  %s796_s0 = inlined_call_operand.hbm [shape: f32[8,8], index: 0, kind: input, shape index: {}]   ;;  %s797_s1 = inlined_call_operand.hbm [shape: f32[8,128], index: 1, kind: input, shape index: {}]   ;;  %s798_s2 = inlined_call_operand.vmem [shape: f32[1,128], index: 2, kind: input, shape index: {}]   ;;  %s799_s3 = inlined_call_operand.hbm [shape: f32[128,128], index: 3, kind: input, shape index: {}]   ;;  %s800_s4 = inlined_call_operand.vmem [shape: f32[1,128], index: 4, kind: input, shape index: {}]   ;;  %s801_s5 = inlined_call_operand.hbm [shape: f32[128,128], index: 5, kind: input, shape index: {}]   ;;  %s802_s6 = inlined_call_operand.vmem [shape: f32[1,128], index: 6, kind: input, shape index: {}]   ;;  %s803_s7 = inlined_call_operand.hbm [shape: f32[8,128], index: 7, kind: output, shape index: {}]  }
   0x1   :  { %13 = vsyncpa [#allocation6], 0 }
   0x2   :  { %14 = vsyncpa [#allocation9], 0 }
   0x3   :  { %15 = vsyncpa [#allocation4], 0  ;;  %s658_s24 = smov [#allocation5]   ;;  %s659_s26 = smov [#allocation2]  }
   0x4   :  { %s32_s25 = sshll.u32 %s658_s24, 4  ;;  %s22_s27 = sshll.u32 %s659_s26, 4  ;;  %s33_s25 = int_to_ptr.vmem [resolvable:$true] %s32_s25  ;;  %s23_s27 = int_to_ptr.vmem [resolvable:$true] %s22_s27 }
   0x5   :  { %s540_s30 = scalar_lea.hbm %s797_s1, 128 }
   0x6   :  { %p541_p0 = scmp.ne.s32.totalorder %s797_s1, %s540_s30  ;;  %p544_p1 = scmp.lt.u32.totalorder %s540_s30, %s797_s1 }
   0x8   :  { %p546_p2 = pnand %p544_p1, %p541_p0 }
   0xa   :  { %549 = shalt.err (!%p546_p2)
}
   0xb   :  { %s550_s12 = scalar_lea.vmem %s33_s25, 128  ;;  %p555_p4 = scmp.lt.s32.totalorder %s33_s25, %s33_s25 }
   0xc   :  { %p551_p3 = scmp.ne.s32.totalorder %s33_s25, %s550_s12  ;;  %p556_p5 = scmp.lt.s32.totalorder %s550_s12, %s550_s12 }
   0xe   :  { %p557_p6 = por %p556_p5, %p555_p4 }
  0x10   :  { %p558_p7 = pnand %p557_p6, %p551_p3 }
  0x12   :  { %561 = shalt.err (!%p558_p7)
}
  0x13   :  { %35 = dma.hbm_to_vmem [thread:$0]  %s797_s1, 128, %s33_s25, [#allocation6]  }
  0x14   :  { %s562_s17 = scalar_lea.hbm %s796_s0, 128 }
  0x15   :  { %p563_p8 = scmp.ne.s32.totalorder %s796_s0, %s562_s17  ;;  %p566_p9 = scmp.lt.u32.totalorder %s562_s17, %s796_s0 }
  0x17   :  { %p568_p10 = pnand %p566_p9, %p563_p8 }
  0x19   :  { %571 = shalt.err (!%p568_p10)
}
  0x1a   :  { %s572_s22 = scalar_lea.vmem %s23_s27, 128  ;;  %p577_p12 = scmp.lt.s32.totalorder %s23_s27, %s23_s27 }
  0x1b   :  { %p573_p11 = scmp.ne.s32.totalorder %s23_s27, %s572_s22  ;;  %p578_p13 = scmp.lt.s32.totalorder %s572_s22, %s572_s22 }
  0x1d   :  { %p579_p0 = por %p578_p13, %p577_p12 }
  0x1f   :  { %p580_p1 = pnand %p579_p0, %p573_p11 }
  0x21   :  { %583 = shalt.err (!%p580_p1)
}
  0x22   :  { %25 = dma.hbm_to_vmem [thread:$0]  %s796_s0, 128, %s23_s27, [#allocation3]  }
  0x23   :  { %s660_s24 = smov [#allocation7]   ;;  %s584_s29 = scalar_lea.hbm %s799_s3, 2048 }
  0x24   :  { %s43_s25 = sshll.u32 %s660_s24, 4  ;;  %p585_p2 = scmp.ne.s32.totalorder %s799_s3, %s584_s29  ;;  %s44_s25 = int_to_ptr.vmem [resolvable:$true] %s43_s25 }
  0x25   :  { %p588_p3 = scmp.lt.u32.totalorder %s584_s29, %s799_s3 }
  0x27   :  { %p590_p4 = pnand %p588_p3, %p585_p2 }
  0x29   :  { %593 = shalt.err (!%p590_p4)
}
  0x2a   :  { %s594_s11 = scalar_lea.vmem %s44_s25, 2048  ;;  %p599_p6 = scmp.lt.s32.totalorder %s44_s25, %s44_s25 }
  0x2b   :  { %p595_p5 = scmp.ne.s32.totalorder %s44_s25, %s594_s11  ;;  %p600_p7 = scmp.lt.s32.totalorder %s594_s11, %s594_s11 }
  0x2d   :  { %p601_p8 = por %p600_p7, %p599_p6 }
  0x2f   :  { %p602_p9 = pnand %p601_p8, %p595_p5 }
  0x31   :  { %605 = shalt.err (!%p602_p9)
}
  0x32   :  { %s661_s0 = smov 128   ;;  %s662_s27 = smov 8  }
  0x33   :  { %49 = dma.hbm_to_vmem [thread:$0]  %s799_s3, 2048, %s44_s25, [#allocation6], %s661_s0, %s661_s0, %s662_s27  }
  0x34   :  { %s663_s14 = smov [#allocation8]   ;;  %s606_s18 = scalar_lea.hbm %s801_s5, 2048 }
  0x35   :  { %s57_s15 = sshll.u32 %s663_s14, 4  ;;  %p607_p10 = scmp.ne.s32.totalorder %s801_s5, %s606_s18  ;;  %s58_s15 = int_to_ptr.vmem [resolvable:$true] %s57_s15 }
  0x36   :  { %p610_p11 = scmp.lt.u32.totalorder %s606_s18, %s801_s5 }
  0x38   :  { %p612_p12 = pnand %p610_p11, %p607_p10 }
  0x3a   :  { %615 = shalt.err (!%p612_p12)
}
  0x3b   :  { %s616_s1 = scalar_lea.vmem %s58_s15, 2048  ;;  %p621_p0 = scmp.lt.s32.totalorder %s58_s15, %s58_s15 }
  0x3c   :  { %p617_p13 = scmp.ne.s32.totalorder %s58_s15, %s616_s1  ;;  %p622_p1 = scmp.lt.s32.totalorder %s616_s1, %s616_s1 }
  0x3e   :  { %p623_p2 = por %p622_p1, %p621_p0 }
  0x40   :  { %p624_p3 = pnand %p623_p2, %p617_p13 }
  0x42   :  { %627 = shalt.err (!%p624_p3)
}
  0x43   :  { %63 = dma.hbm_to_vmem [thread:$0]  %s801_s5, 2048, %s58_s15, [#allocation9], %s661_s0, %s661_s0, %s662_s27  }
  0x44   :  { %650 = dma.done.wait [#allocation3], 128  }
  0x45   :  { %651 = vsyncadd [#allocation3], 4294967168 }
  0x46   :  { %652 = dma.done.wait [#allocation6], 2176  }
  0x47   :  { %653 = vsyncadd [#allocation6], 4294965120 }
  0x48   :  { %654 = dma.done.wait [#allocation9], 2048  }
  0x49   :  { %655 = vsyncadd [#allocation9], 4294965248  ;;  %v664_v0 = vmov 0.0   ;;  %vm665_vm0 = vmmov 0   ;;  %v666_v1 = vmov 0.0|0.0   ;;  %vm87_vm1 = vcmask 64512  }
  0x4a   :  { %407 = vmatprep.subr.mxu0 %v664_v0  ;;  %409 = vmatprep.mubr.msk.f32.mxu0 %vm665_vm0, %v664_v0  ;;  %v79_v2 = vld [vmem:[#allocation5] sm:$0xff]  ;;  %v78_v3 = vld [vmem:[#allocation2] sm:$0xff]  ;;  %v162_v4 = vld [vmem:[#allocation7] sm:$0xff]  ;;  %s667_s29 = smov [#allocation10]  }
  0x4b   :  { %482 = vmatprep.subr.bf16.mxu1 %v666_v1  ;;  %444 = vmatprep.mubr.msk.f32.mxu1 %vm665_vm0, %v664_v0  ;;  %v163_v5 = vld [vmem:[#allocation7 + $0x8] sm:$0xff]  ;;  %v164_v6 = vld [vmem:[#allocation7 + $0x10] sm:$0xff]  ;;  %v165_v7 = vld [vmem:[#allocation7 + $0x18] sm:$0xff]  ;;  %s356_s30 = sshll.u32 %s667_s29, 4  ;;  %s357_s30 = int_to_ptr.vmem [resolvable:$true] %s356_s30 }
  0x4c   :  { %408 = vmatpush3.msra.mxu0 %v79_v2  ;;  %v483_v8 = vpack.c.bf16 %v163_v5, %v162_v4  ;;  %v486_v9 = vpack.c.bf16 %v165_v7, %v164_v6  ;;  %v166_v10 = vld [vmem:[#allocation7 + $0x20] sm:$0xff]  ;;  %v167_v11 = vld [vmem:[#allocation7 + $0x28] sm:$0xff]  ;;  %v168_v13 = vld [vmem:[#allocation7 + $0x30] sm:$0xff]  ;;  %s628_s8 = scalar_lea.vmem %s357_s30, 128  ;;  %p633_p5 = scmp.lt.s32.totalorder %s357_s30, %s357_s30 }
  0x4d   :  { %410 = vmatmul.mubr.msk.f32.vlgmr.msra.gmra.mrb[0].mxu0 %vm87_vm1, %v78_v3  ;;  %506 = vmatprep.subr.bf16.mxu0 %v666_v1  ;;  %v489_v12 = vpack.c.bf16 %v167_v11, %v166_v10  ;;  %v169_v14 = vld [vmem:[#allocation7 + $0x38] sm:$0xff]  ;;  %v170_v16 = vld [vmem:[#allocation7 + $0x40] sm:$0xff]  ;;  %v171_v17 = vld [vmem:[#allocation7 + $0x48] sm:$0xff]  ;;  %p629_p4 = scmp.ne.s32.totalorder %s357_s30, %s628_s8  ;;  %p634_p6 = scmp.lt.s32.totalorder %s628_s8, %s628_s8 }
  0x4e   :  { %479 = vmatprep.mubr.msk.f32.mxu0 %vm665_vm0, %v664_v0  ;;  %484 = vmatpush3.bf16.msra.mxu1 %v483_v8  ;;  %v492_v15 = vpack.c.bf16 %v169_v14, %v168_v13  ;;  %v495_v18 = vpack.c.bf16 %v171_v17, %v170_v16  ;;  %v172_v19 = vld [vmem:[#allocation7 + $0x50] sm:$0xff]  ;;  %v173_v20 = vld [vmem:[#allocation7 + $0x58] sm:$0xff]  ;;  %v174_v22 = vld [vmem:[#allocation7 + $0x60] sm:$0xff] }
  0x4f   :  { %485 = vmatprep.subr.bf16.mxu1 %v666_v1  ;;  %v498_v21 = vpack.c.bf16 %v173_v20, %v172_v19  ;;  %v175_v23 = vld [vmem:[#allocation7 + $0x68] sm:$0xff]  ;;  %v176_v25 = vld [vmem:[#allocation7 + $0x70] sm:$0xff]  ;;  %v177_v26 = vld [vmem:[#allocation7 + $0x78] sm:$0xff]  ;;  %p635_p7 = por %p634_p6, %p633_p5 }
  0x50   :  { %v501_v24 = vpack.c.bf16 %v175_v23, %v174_v22  ;;  %v504_v27 = vpack.c.bf16 %v177_v26, %v176_v25  ;;  %v256_v28 = vld [vmem:[#allocation8] sm:$0xff]  ;;  %v257_v29 = vld [vmem:[#allocation8 + $0x8] sm:$0xff]  ;;  %v258_v30 = vld [vmem:[#allocation8 + $0x10] sm:$0xff] }
  0x51   :  { %v507_v31 = vpack.c.bf16 %v257_v29, %v256_v28  ;;  %v259_v32 = vld [vmem:[#allocation8 + $0x18] sm:$0xff]  ;;  %v260_v34 = vld [vmem:[#allocation8 + $0x20] sm:$0xff]  ;;  %v261_v35 = vld [vmem:[#allocation8 + $0x28] sm:$0xff]  ;;  %p636_p8 = pnand %p635_p7, %p629_p4 }
  0x52   :  { %487 = vmatpush3.bf16.msra.mxu1 %v486_v9  ;;  %v510_v33 = vpack.c.bf16 %v259_v32, %v258_v30  ;;  %v513_v36 = vpack.c.bf16 %v261_v35, %v260_v34  ;;  %v262_v37 = vld [vmem:[#allocation8 + $0x30] sm:$0xff]  ;;  %v263_v38 = vld [vmem:[#allocation8 + $0x38] sm:$0xff]  ;;  %v264_v40 = vld [vmem:[#allocation8 + $0x40] sm:$0xff] }
  0x53   :  { %488 = vmatprep.subr.bf16.mxu1 %v666_v1  ;;  %508 = vmatpush3.bf16.msra.mxu0 %v507_v31  ;;  %v516_v39 = vpack.c.bf16 %v263_v38, %v262_v37  ;;  %v265_v41 = vld [vmem:[#allocation8 + $0x48] sm:$0xff]  ;;  %v266_v43 = vld [vmem:[#allocation8 + $0x50] sm:$0xff]  ;;  %v267_v44 = vld [vmem:[#allocation8 + $0x58] sm:$0xff] }
  0x54   :  { %509 = vmatprep.subr.bf16.mxu0 %v666_v1  ;;  %v519_v42 = vpack.c.bf16 %v265_v41, %v264_v40  ;;  %v522_v45 = vpack.c.bf16 %v267_v44, %v266_v43  ;;  %v268_v46 = vld [vmem:[#allocation8 + $0x60] sm:$0xff]  ;;  %v269_v47 = vld [vmem:[#allocation8 + $0x68] sm:$0xff]  ;;  %v367_v49 = vld [vmem:[%s798_s2] ss:$0 sm:$0xff] }
  0x55   :  { %v525_v48 = vpack.c.bf16 %v269_v47, %v268_v46  ;;  %v270_v54 = vld [vmem:[#allocation8 + $0x70] sm:$0xff]  ;;  %v271_v55 = vld [vmem:[#allocation8 + $0x78] sm:$0xff] }
  0x56   :  { %490 = vmatpush3.bf16.msra.mxu1 %v489_v12  ;;  %v528_v56 = vpack.c.bf16 %v271_v55, %v270_v54  ;;  %v369_v57 = vld [vmem:[%s800_s4] ss:$0 sm:$0xff] }
  0x57   :  { %491 = vmatprep.subr.bf16.mxu1 %v666_v1  ;;  %511 = vmatpush3.bf16.msra.mxu0 %v510_v33  ;;  %v370_v62 = vld [vmem:[%s802_s6] ss:$0 sm:$0xff] }
  0x58   :  { %512 = vmatprep.subr.bf16.mxu0 %v666_v1 }
  0x5a   :  { %493 = vmatpush3.bf16.msra.mxu1 %v492_v15 }
  0x5b   :  { %494 = vmatprep.subr.bf16.mxu1 %v666_v1  ;;  %514 = vmatpush3.bf16.msra.mxu0 %v513_v36 }
  0x5c   :  { %515 = vmatprep.subr.bf16.mxu0 %v666_v1 }
  0x5e   :  { %496 = vmatpush3.bf16.msra.mxu1 %v495_v18 }
  0x5f   :  { %497 = vmatprep.subr.bf16.mxu1 %v666_v1  ;;  %517 = vmatpush3.bf16.msra.mxu0 %v516_v39 }
  0x60   :  { %518 = vmatprep.subr.bf16.mxu0 %v666_v1 }
  0x62   :  { %499 = vmatpush3.bf16.msra.mxu1 %v498_v21 }
  0x63   :  { %500 = vmatprep.subr.bf16.mxu1 %v666_v1  ;;  %520 = vmatpush3.bf16.msra.mxu0 %v519_v42 }
  0x64   :  { %521 = vmatprep.subr.bf16.mxu0 %v666_v1 }
  0x66   :  { %502 = vmatpush3.bf16.msra.mxu1 %v501_v24 }
  0x67   :  { %503 = vmatprep.subr.bf16.mxu1 %v666_v1  ;;  %523 = vmatpush3.bf16.msra.mxu0 %v522_v45 }
  0x68   :  { %524 = vmatprep.subr.bf16.mxu0 %v666_v1 }
  0x6a   :  { %505 = vmatpush3.bf16.msra.mxu1 %v504_v27 }
  0x6b   :  { %526 = vmatpush3.bf16.msra.mxu0 %v525_v48 }
  0x6c   :  { %527 = vmatprep.subr.bf16.mxu0 %v666_v1 }
  0x6f   :  { %529 = vmatpush3.bf16.msra.mxu0 %v528_v56 }
 0x120   :  { %v157_v50 = vpop.f32.mrb[0].mxu0 }
 0x121   :  { %v158_v51 = vadd.f32 %v367_v49, %v157_v50  ;;  %v411_v52 = vpop.f32.mrb[1].mxu0 }
 0x123   :  { %v161_v53 = vmax.f32 %v158_v51, 0.0 }
 0x125   :  { %445 = vmatmul.mubr.f32.vlgmr.msra.gmra.mrb[0].mxu1 %v161_v53 }
 0x1f8   :  { %v251_v58 = vpop.f32.mrb[0].mxu1 }
 0x1f9   :  { %v252_v59 = vadd.f32 %v369_v57, %v251_v58  ;;  %v446_v60 = vpop.f32.mrb[1].mxu1 }
 0x1fb   :  { %v255_v61 = vmax.f32 %v252_v59, 0.0 }
 0x1fd   :  { %480 = vmatmul.mubr.f32.vlgmr.msra.gmra.mrb[2].mxu0 %v255_v61 }
 0x2d0   :  { %v345_v63 = vpop.f32.mrb[2].mxu0 }
 0x2d1   :  { %v346_v0 = vadd.f32 %v370_v62, %v345_v63  ;;  %v481_v1 = vpop.f32.mrb[3].mxu0 }
 0x2d3   :  { %349 = vst [vmem:[#allocation10] sm:$0xff] %v346_v0 }
 0x2d4   :  { %639 = shalt.err (!%p636_p8)
}
 0x2d5   :  { %s640_s10 = scalar_lea.hbm %s803_s7, 128 }
 0x2d6   :  { %p641_p9 = scmp.ne.s32.totalorder %s803_s7, %s640_s10  ;;  %p644_p10 = scmp.lt.u32.totalorder %s640_s10, %s803_s7 }
 0x2d8   :  { %p646_p11 = pnand %p644_p10, %p641_p9 }
 0x2da   :  { %649 = shalt.err (!%p646_p11)
}
 0x2db   :  { %359 = dma.vmem_to_hbm [thread:$0]  %s357_s30, 128, %s803_s7, [#allocation4]  }
 0x2dc   :  { %656 = dma.done.wait [#allocation4], 128  }
 0x2dd   :  { %657 = vsyncadd [#allocation4], 4294967168 }
 0x2de   :  { %363 = vsyncpa [#allocation3], 1 }
 0x2df   :  { %364 = vsyncpa [#allocation6], 1 }
 0x2e0   :  { %365 = vsyncpa [#allocation9], 1 }
 0x2e1   :  { %366 = vsyncpa [#allocation4], 1 }

</bundles_post_ra>
